<compile_context>
chip_gen: v6e
topology: v6e:2x2x1
jax: 0.10.0
libtpu: 0.0.40
codegen_flags: <defaults>
</compile_context>

<pallas_src>
import math

import jax
import jax.numpy as jnp
from jax import lax
from jax.experimental import pallas as pl
from jax.experimental.pallas import tpu as pltpu


def _round_up(x, m):
    return (x + m - 1) // m * m


def _largest_divisor_leq(n, cap):
    cap = max(1, min(n, cap))
    for d in range(cap, 0, -1):
        if n % d == 0:
            return d
    return 1


def _tpu_budgets(itemsize):
    """Per-generation block / VMEM budgets (best-effort hardware query)."""
    vmem_cap = None
    try:
        info = pltpu.get_tpu_info()
        for attr in ("vmem_capacity_bytes", "vmem_size_bytes", "vmem_bytes"):
            v = getattr(info, attr, None)
            if v:
                vmem_cap = int(v)
                break
    except Exception:
        vmem_cap = None
    if vmem_cap is None:
        try:
            kind = jax.devices()[0].device_kind.lower()
            if "v5" in kind or "v6" in kind:
                vmem_cap = 128 << 20
        except Exception:
            pass
    if vmem_cap is None:
        vmem_cap = 64 << 20              # conservative: assume v7x-class part

    if vmem_cap <= (96 << 20):           # v7x: 64 MiB VMEM / TC, 2 TCs / chip
        budget_bytes = 44 << 20
        vmem_cap_limit = 56 << 20        # stay well inside 64 MiB physical VMEM
        multi_core = True
    else:                                # v5e / v6e: 128 MiB VMEM, 1 TC / chip
        budget_bytes = 88 << 20
        vmem_cap_limit = 100 << 20
        multi_core = False

    # Per block element: 2x-buffered input + output (4*itemsize bytes) plus
    # roughly two block-sized f32 temporaries inside the elementwise/reduce chain.
    bytes_per_elem = 4 * itemsize + 8
    max_block_elems = max(8 * 128, (budget_bytes - (8 << 20)) // bytes_per_elem)
    return max_block_elems, bytes_per_elem, vmem_cap_limit, multi_core


def _pick_spatial_tile(hw, c_pad, max_block_elems):
    """Largest lane-dense (multiple-of-128) spatial tile within the budget."""
    lane_budget = max(128, (max_block_elems // c_pad) // 128 * 128)
    if lane_budget >= hw:
        return hw                        # full spatial extent (always legal)
    if hw % 128 == 0:
        n128 = hw // 128
        cap = max(1, min(lane_budget // 128, n128))
        for d in range(cap, 0, -1):      # multiple-of-128 divisor -> no masked tail
            if n128 % d == 0:
                return d * 128
    return lane_budget                   # ragged HW: Pallas masks the tail tile


def _attention_kernel(x_ref, w_ref, b_ref, o_ref):
    """x_ref/o_ref: (Nb, C, T) VMEM tiles. w_ref: (C, 1) f32 VMEM. b_ref: (1,1) SMEM."""
    nb = x_ref.shape[0]
    w = w_ref[...]                                            # (C, 1) f32, resident
    b = b_ref[0, 0]

    def one_sample(i, carry):
        x = x_ref[i].astype(jnp.float32)                      # (C, T)
        # Packed 1x1-conv channel reduction: one full-tile VPU multiply by the
        # weight column + one sublane (XLU) reduce.
        z = jnp.sum(x * w, axis=0, keepdims=True) + b         # (1, T)
        # sigmoid(z) = 0.5*tanh(z/2) + 0.5 -> transcendental on the EUP, no VALU divide.
        att = 0.5 * jnp.tanh(0.5 * z) + 0.5
        # repeat(1, C, 1, 1) gate:  x + x*a == x * (1 + a), broadcast over channels.
        o_ref[i] = (x * (1.0 + att)).astype(o_ref.dtype)
        return carry

    lax.fori_loop(0, nb, one_sample, 0, unroll=(nb <= 8))


def attention_layer(x, weight, bias):
    """x: (N, C, H, W). weight: (1, C, 1, 1). bias: (1,)."""
    N, C, H, W = x.shape
    HW = H * W
    x_flat = x.reshape(N, C, HW)

    itemsize = jnp.dtype(x.dtype).itemsize
    sublane = max(8, 32 // itemsize)                 # f32 -> 8, bf16 -> 16, int8 -> 32
    c_pad = _round_up(C, sublane)                    # VMEM sublane padding of C
    max_block_elems, bytes_per_elem, vmem_cap_limit, multi_core = _tpu_budgets(itemsize)

    hw_pad = _round_up(HW, 128)
    per_sample_elems = c_pad * hw_pad

    if per_sample_elems >= max_block_elems:
        # Large spatial extent: one sample per block, tile HW lane-dense.
        nb = 1
        t_hw = _pick_spatial_tile(HW, c_pad, max_block_elems)
    else:
        # Small samples: pack whole samples per block (Nb divides N), amortizing
        # the ~0.35us/step overhead for large-N / small-HW shapes.
        t_hw = HW
        nb = _largest_divisor_leq(N, max_block_elems // per_sample_elems)

    n_batch = pl.cdiv(N, nb)
    n_tiles = pl.cdiv(HW, t_hw)

    if multi_core:
        # Only a 2-TC (v7x-class) part benefits from splitting a tiny workload
        # into >= 4 grid points (2 pipelined steps per TensorCore).
        while n_batch * n_tiles < 4:
            if nb > 1:
                nb = _largest_divisor_leq(N, nb - 1)
                n_batch = N // nb
            elif t_hw % 256 == 0 and t_hw >= 512:
                t_hw //= 2
                n_tiles = pl.cdiv(HW, t_hw)
            else:
                break

    w_col = weight.reshape(C, 1).astype(jnp.float32)
    b2d = bias.reshape(1, 1).astype(jnp.float32)

    blk_elems = nb * c_pad * _round_up(t_hw, 128)
    vmem_limit = int(min(vmem_cap_limit,
                         max(32 << 20, blk_elems * bytes_per_elem + (8 << 20))))

    out_flat = pl.pallas_call(
        _attention_kernel,
        out_shape=jax.ShapeDtypeStruct((N, C, HW), x.dtype),
        grid=(n_batch, n_tiles),
        in_specs=[
            pl.BlockSpec((nb, C, t_hw), lambda b, s: (b, 0, s)),       # x tile
            pl.BlockSpec((C, 1), lambda b, s: (0, 0)),                 # weight column (VMEM)
            pl.BlockSpec((1, 1), lambda b, s: (0, 0),
                         memory_space=pltpu.SMEM),                     # bias scalar
        ],
        out_specs=pl.BlockSpec((nb, C, t_hw), lambda b, s: (b, 0, s)),
        compiler_params=pltpu.CompilerParams(
            dimension_semantics=("parallel", "parallel"),
            vmem_limit_bytes=vmem_limit,
        ),
    )(x_flat, w_col, b2d)
    return out_flat.reshape(N, C, H, W)


def init_params(key, input_channels):
    """Deterministic init matching the PyTorch module's __init__:
    xavier_uniform_(weight, gain=0.01/input_channels); default Conv2d bias init."""
    kw, kb = jax.random.split(key)
    fan_in = input_channels          # C * 1 * 1
    fan_out = 1                      # 1 * 1 * 1
    gain = 0.01 / input_channels
    w_bound = gain * math.sqrt(6.0 / (fan_in + fan_out))
    weight = jax.random.uniform(
        kw, (1, input_channels, 1, 1), jnp.float32, -w_bound, w_bound)
    b_bound = 1.0 / math.sqrt(fan_in)
    bias = jax.random.uniform(kb, (1,), jnp.float32, -b_bound, b_bound)
    return weight, bias


def _reference(x, weight, bias):
    # Pure-JAX reference of the PyTorch forward.
    w = weight.reshape(1, -1, 1, 1)
    a = jax.nn.sigmoid(jnp.sum(x * w, axis=1, keepdims=True) + bias[0])
    return x + x * a


if __name__ == "__main__":
    key = jax.random.PRNGKey(0)
    k_x, k_p = jax.random.split(key)

    N, C, H, W = 2, 4, 16, 16
    x = jax.random.normal(k_x, (N, C, H, W), jnp.float32)
    weight, bias = init_params(k_p, C)

    out = jax.block_until_ready(attention_layer(x, weight, bias))
    ref = _reference(x, weight, bias)
    assert out.shape == (N, C, H, W)
    assert jnp.allclose(out, ref, atol=1e-5, rtol=1e-5)

    # Larger spatial extent: exercises lane-dense spatial tiling / multi-tile grid.
    x2 = jax.random.normal(k_x, (1, 4, 64, 64), jnp.float32)
    out2 = jax.block_until_ready(attention_layer(x2, weight, bias))
    assert jnp.allclose(out2, _reference(x2, weight, bias), atol=1e-5, rtol=1e-5)

    # Large-N / small-HW: exercises whole-sample batch blocking (Nb > 1).
    x3 = jax.random.normal(k_x, (6, 4, 8, 8), jnp.float32)
    out3 = jax.block_until_ready(attention_layer(x3, weight, bias))
    assert jnp.allclose(out3, _reference(x3, weight, bias), atol=1e-5, rtol=1e-5)

    print("KERNEL_OK")
</pallas_src>

<mosaic_0001>
module attributes {stable_mosaic.version = 11 : i64} {
  func.func @_attention_kernel(%arg0: i32, %arg1: i32, %arg2: memref<1x4x256xf32, #tpu.memory_space<vmem>>, %arg3: memref<4x1xf32, #tpu.memory_space<vmem>>, %arg4: memref<1x1xf32, #tpu.memory_space<smem>>, %arg5: memref<1x4x256xf32, #tpu.memory_space<vmem>>) attributes {dimension_semantics = [#tpu.dimension_semantics<parallel>, #tpu.dimension_semantics<parallel>], iteration_bounds = array<i64: 2, 1>, scalar_prefetch = 0 : i64, scratch_operands = 0 : i64, tpu.core_type = #tpu.core_type<tc>, window_params = [{transform_indices = @transform_0, window_bounds = array<i64: 1, 4, 256>}, {pipeline_mode = #tpu.pipeline_mode<synchronous>, transform_indices = @transform_1, window_bounds = array<i64: 4, 1>}, {transform_indices = @transform_2, window_bounds = array<i64: 1, 1>}, {transform_indices = @transform_3, window_bounds = array<i64: 1, 4, 256>}]} {
    %c0 = arith.constant 0 : index
    %c0_0 = arith.constant 0 : index
    %0 = vector.load %arg3[%c0, %c0_0] : memref<4x1xf32, #tpu.memory_space<vmem>>, vector<4x1xf32>
    %c0_1 = arith.constant 0 : index
    %c0_2 = arith.constant 0 : index
    %1 = memref.load %arg4[%c0_1, %c0_2] : memref<1x1xf32, #tpu.memory_space<smem>>
    %c0_i32 = arith.constant 0 : i32
    %2 = arith.index_cast %c0_i32 : i32 to index
    %c0_3 = arith.constant 0 : index
    %c0_4 = arith.constant 0 : index
    %3 = vector.load %arg2[%2, %c0_3, %c0_4] : memref<1x4x256xf32, #tpu.memory_space<vmem>>, vector<1x4x256xf32>
    %4 = vector.shape_cast %3 : vector<1x4x256xf32> to vector<4x256xf32>
    %5 = vector.broadcast %0 : vector<4x1xf32> to vector<4x256xf32>
    %6 = arith.mulf %4, %5 : vector<4x256xf32>
    %cst = arith.constant dense<0.000000e+00> : vector<256xf32>
    %7 = vector.multi_reduction <add>, %6, %cst [0] : vector<4x256xf32> to vector<256xf32>
    %8 = vector.shape_cast %7 : vector<256xf32> to vector<1x256xf32>
    %9 = vector.broadcast %1 : f32 to vector<1x256xf32>
    %10 = arith.addf %8, %9 : vector<1x256xf32>
    %cst_5 = arith.constant 5.000000e-01 : f32
    %11 = vector.broadcast %cst_5 : f32 to vector<1x256xf32>
    %12 = arith.mulf %11, %10 : vector<1x256xf32>
    %13 = math.tanh %12 : vector<1x256xf32>
    %cst_6 = arith.constant 5.000000e-01 : f32
    %14 = vector.broadcast %cst_6 : f32 to vector<1x256xf32>
    %15 = arith.mulf %14, %13 : vector<1x256xf32>
    %cst_7 = arith.constant 5.000000e-01 : f32
    %16 = vector.broadcast %cst_7 : f32 to vector<1x256xf32>
    %17 = arith.addf %15, %16 : vector<1x256xf32>
    %cst_8 = arith.constant 1.000000e+00 : f32
    %18 = vector.broadcast %cst_8 : f32 to vector<1x256xf32>
    %19 = arith.addf %18, %17 : vector<1x256xf32>
    %20 = vector.broadcast %19 : vector<1x256xf32> to vector<4x256xf32>
    %21 = arith.mulf %4, %20 : vector<4x256xf32>
    %22 = arith.index_cast %c0_i32 : i32 to index
    %c0_9 = arith.constant 0 : index
    %c0_10 = arith.constant 0 : index
    %23 = vector.load %arg5[%22, %c0_9, %c0_10] : memref<1x4x256xf32, #tpu.memory_space<vmem>>, vector<1x4x256xf32>
    %24 = vector.shape_cast %23 : vector<1x4x256xf32> to vector<4x256xf32>
    %25 = vector.shape_cast %21 : vector<4x256xf32> to vector<1x4x256xf32>
    tpu.vector_store %arg5[%22, %c0_9, %c0_10], %25 {strides = array<i32>} : memref<1x4x256xf32, #tpu.memory_space<vmem>>, vector<1x4x256xf32>,
    %c1_i32 = arith.constant 1 : i32
    return
  }
  func.func @transform_0(%arg0: i32, %arg1: i32) -> (i32, i32, i32) {
    %c0_i32 = arith.constant 0 : i32
    %c0_i32_0 = arith.constant 0 : i32
    return %arg0, %c0_i32, %arg1 : i32, i32, i32
  }
  func.func @transform_1(%arg0: i32, %arg1: i32) -> (i32, i32) {
    %c0_i32 = arith.constant 0 : i32
    %c0_i32_0 = arith.constant 0 : i32
    %c0_i32_1 = arith.constant 0 : i32
    return %c0_i32, %c0_i32_0 : i32, i32
  }
  func.func @transform_2(%arg0: i32, %arg1: i32) -> (i32, i32) {
    %c0_i32 = arith.constant 0 : i32
    %c0_i32_0 = arith.constant 0 : i32
    %c0_i32_1 = arith.constant 0 : i32
    return %c0_i32, %c0_i32_0 : i32, i32
  }
  func.func @transform_3(%arg0: i32, %arg1: i32) -> (i32, i32, i32) {
    %c0_i32 = arith.constant 0 : i32
    %c0_i32_0 = arith.constant 0 : i32
    return %arg0, %c0_i32, %arg1 : i32, i32, i32
  }
}

</mosaic_0001>

<bundles_post_ra>
// kernel: tpu_custom_call.1
= control target key start
LH: loop header
LB: loop body
LE: loop exit
PB: predicated region body
PF: predicated region fallthrough
CT: control target
= control target key end

     0   :  { %s726_s0 = inlined_call_operand.hbm [shape: f32[2,4,256], index: 0, kind: input, shape index: {}]   ;;  %s727_s1 = inlined_call_operand.vmem [shape: f32[4,1], index: 1, kind: input, shape index: {}]   ;;  %s728_s2 = inlined_call_operand.<no memory space> [shape: f32[1,1], index: 2, kind: input, shape index: {}]   ;;  %s729_s3 = inlined_call_operand.hbm [shape: f32[2,4,256], index: 3, kind: output, shape index: {}]  }
   0x1   :  { %8 = sst [smem:[#allocation2]] %s728_s2 }
   0x2   :  { %9 = vsyncpa [#allocation4], 0 }
   0x3   :  { %11 = vsyncpa [#allocation4 + $0x1], 0 }
   0x4   :  { %12 = vsyncpa [#allocation5], 0 }
   0x5   :  { %14 = vsyncpa [#allocation5 + $0x1], 0  ;;  %s585_s14 = smov 0   ;;  %s587_s15 = smov 0  }
   0x6   :  { %s589_s16 = smov 0   ;;  %s591_s17 = smov 0  }
   0x7   :  { %s593_s18 = smov 0   ;;  %s595_s19 = smov 0  }
   0x8 LB: > { %s362_s2 = sadd.s32 4294967295, %s556_s19   ;;  %s363_s20 = sadd.s32 4294967294, %s556_s19   ;;  %s556_s19 = sphi %s595_s19, %s20_s19   ;;  %s552_s18 = sphi %s593_s18, %s741_s18   ;;  %s548_s17 = sphi %s591_s17, %s740_s17   ;;  %s544_s16 = sphi %s589_s16, %s739_s16   ;;  %s540_s15 = sphi %s587_s15, %s738_s15   ;;  %s536_s14 = sphi %s585_s14, %s737_s14  }
   0x9   : > { %s32_s21 = sadd.s32 1, %s552_s18  ;;  %s41_s22 = sadd.s32 1, %s544_s16 }
   0xa   : > { %p34_p0 = scmp.ge.s32.totalorder %s32_s21, 2  ;;  %p48_p1 = scmp.ne.s32.totalorder %s544_s16, %s540_s15 }
   0xb   : > { %p49_p2 = scmp.eq.s32.totalorder %s556_s19, 0  ;;  %p54_p3 = scmp.ne.s32.totalorder %s540_s15, %s536_s14 }
   0xc   : > { %s743_s21 = smov (%p34_p0, %s32_s21), 0  ;;  %p55_p5 = scmp.eq.s32.totalorder %s362_s2, 0 }
   0xd   : > { %p626_p4 = por %p49_p2, %p48_p1  ;;  %s36_s24 = ssub.s32 %s552_s18, %s743_s21 }
   0xe   : > { %p122_p6 = scmp.eq.s32.totalorder %s362_s2, 1  ;;  %p39_p7 = scmp.eq.s32.totalorder %s36_s24, 0 }
   0xf   : > { %p632_p8 = por %p55_p5, %p54_p3  ;;  %p128_p10 = scmp.eq.s32.totalorder %s363_s20, 1 }
  0x10   : > { %p636_p9 = por %p122_p6, %p48_p1  ;;  %p391_p13 = scmp.lt.s32.totalorder %s556_s19, 2 }
  0x11   : > { %s641_s27 = scalar_select %p39_p7, %s544_s16, %s41_s22  }
  0x12   : > { %p643_p11 = por %p128_p10, %p54_p3  ;;  %s154_s29 = sand.u32 1, %s544_s16  }
  0x13   : > { %s366_s30 = sshll.u32 %s154_s29, 3  ;;  %s377_s4 = sshll.u32 %s552_s18, 7 }
  0x14   : > { %s733_s28 = scalar_select %p643_p11, 1, 0 }
  0x15   : > { %s166_s7 = scalar_lea.hbm %s726_s0, %s377_s4  ;;  %s158_s8 = scalar_lea.vmem [#allocation3], %s366_s30 }
  0x16   : > { %s168_s9 = sshll.u32 %s158_s8, 4  ;;  %p656_p0 = pnand %p391_p13, %p626_p4  ;;  %s169_s9 = int_to_ptr.vmem [resolvable:$true] %s168_s9 }
  0x17   : > { %p369_p1 = scmp.ge.s32.totalorder %s556_s19, 1  ;;  %p173_p2 = scmp.lt.s32.totalorder %s556_s19, 3 }
  0x18   : > { %s155_s11 = scalar_lea.sflag [#allocation4], %s154_s29  ;;  %p450_p3 = pneg %p656_p0 }
  0x19   : > { %s461_s12 = scalar_lea.vmem %s169_s9, 128  ;;  %s558_s13 = smov [#allocation3]  }
  0x1a   : > { %p462_p5 = scmp.ne.s32.totalorder %s169_s9, %s461_s12  ;;  %s466_s2 = sshll.u32 %s558_s13, 4  ;;  %s467_s2 = int_to_ptr.vmem [resolvable:$false] %s466_s2 }
  0x1b   : > { %s468_s20 = scalar_lea.vmem %s467_s2, 256  ;;  %p469_p10 = scmp.lt.s32.totalorder %s169_s9, %s467_s2 }
  0x1c   : > { %p464_p6 = pnand %p462_p5, %p450_p3  ;;  %p470_p12 = scmp.lt.s32.totalorder %s468_s20, %s461_s12 }
  0x1e   : > { %p465_p7 = pneg %p464_p6  ;;  %p471_p4 = por %p470_p12, %p469_p10 }
  0x20   : > { %p472_p13 = pnand %p471_p4, %p465_p7 }
  0x22   : > { %475 = shalt.err (!%p472_p13)
}
  0x23   : > { %386 = dma.hbm_to_vmem [thread:$0]  (!%p656_p0), %s166_s7, 128, %s169_s9, %s155_s11  }
  0x24   : > { %p174_p11 = pnand %p369_p1, %p173_p2 }
  0x25   : > { %s671_s22 = sand.u32 (!%p174_p11), 1, %s540_s15  }
  0x26   : > { %177 = sbr.rel (%p174_p11) target bundleno = 230 (0xe6), region = 32  ;;  %s370_s23 = sshll.u32 (!%p174_p11), %s671_s22, 3 }
  0x27   : > { %s180_s24 = scalar_lea.sflag (!%p174_p11), [#allocation4], %s671_s22  ;;  %s183_s29 = scalar_lea.vmem (!%p174_p11), [#allocation3], %s370_s23 }
  0x2b   : > { %527 = dma.done.wait (%p632_p8), %s180_s24, 128  }
  0x2c   : > { %529 = vsyncadd (%p632_p8), %s180_s24, 4294967168  ;;  %v559_v0 = vmov 0   ;;  %v208_v1 = vld [vmem:[%s727_s1] sm:$0xf]  ;;  %v560_v2 = vmov 839922192   ;;  %v218_v4 = vlaneseq }
  0x2d   : > { %443 = vset.pattern.permute.xlu0 %v559_v0  ;;  %v216_v3 = vunpack.c.l.s4 %v560_v2  ;;  %v210_v8 = vld [vmem:[%s183_s29] sm:$0xff]  ;;  %vm227_vm0 = vcmask 1043456   ;;  %s209_s25 = sld [smem:[#allocation2]]  ;;  %s378_s5 = sshll.u32 %s548_s17, 7 }
  0x2e   : > { %213 = vperm.xlu0 %443, %v208_v1   ;;  %v219_v6 = vshrl.u32 %v218_v4, 7  ;;  %s205_s6 = scalar_lea.vmem [#allocation6], %s370_s23  ;;  %s276_s10 = scalar_lea.hbm %s729_s3, %s378_s5 }
  0x2f   : > { %v217_v5 = vunpack.c.0.s8 %v216_v3  ;;  %s278_s7 = sshll.u32 %s205_s6, 4  ;;  %s262_s11 = scalar_lea.sflag [#allocation5], %s671_s22  ;;  %s279_s7 = int_to_ptr.vmem [resolvable:$true] %s278_s7 }
  0x30   : > { %s476_s12 = scalar_lea.vmem %s279_s7, 128  ;;  %s561_s13 = smov [#allocation6]  }
  0x31   : > { %v220_v7 = vsub.s32 %v217_v5, %v219_v6  ;;  %p477_p8 = scmp.ne.s32.totalorder %s279_s7, %s476_s12  ;;  %s480_s2 = sshll.u32 %s561_s13, 4  ;;  %s481_s2 = int_to_ptr.vmem [resolvable:$false] %s480_s2 }
  0x32   : > { %s482_s17 = scalar_lea.vmem %s481_s2, 256  ;;  %p483_p0 = scmp.lt.s32.totalorder %s279_s7, %s481_s2 }
  0x33   : > { %v242_v24 = vstv %s209_s25  ;;  %p478_p11 = pnand %p477_p8, %p636_p9  ;;  %p484_p1 = scmp.lt.s32.totalorder %s482_s17, %s476_s12 }
  0x35   : > { %p479_p12 = pneg %p478_p11  ;;  %p485_p2 = por %p484_p1, %p483_p0 }
  0x37   : > { %p486_p3 = pnand %p485_p2, %p479_p12 }
  0xa9   : > { %v214_v9 = vpop.permute.xlu0 %213 }
  0xaa   : > { %v221_v10 = vrot.slane %v214_v9, %v220_v7 }
  0xac   : > { %v223_v11 = vmul.f32 %v221_v10, %v210_v8 }
  0xae   : > { %v225_v12 = vcombine.high %v223_v11, %v223_v11  ;;  %v228_v13 = vsel %vm227_vm0, %v223_v11, 0.0 }
  0xaf   : > { %v229_v14 = vrot.slane %v228_v13, 4 }
  0xb0   : > { %v235_v15 = vsel %vm227_vm0, %v225_v12, 0.0 }
  0xb1   : > { %v230_v16 = vadd.f32 %v229_v14, %v228_v13  ;;  %v236_v17 = vrot.slane %v235_v15, 4 }
  0xb3   : > { %v231_v18 = vrot.slane %v230_v16, 2  ;;  %v237_v19 = vadd.f32 %v236_v17, %v235_v15 }
  0xb5   : > { %v232_v20 = vadd.f32 %v231_v18, %v230_v16  ;;  %v238_v21 = vrot.slane %v237_v19, 2 }
  0xb7   : > { %v233_v22 = vrot.slane %v232_v20, 1  ;;  %v239_v23 = vadd.f32 %v238_v21, %v237_v19 }
  0xb9   : > { %v234_v25 = vadd.f32 %v233_v22, %v232_v20  ;;  %v240_v26 = vrot.slane %v239_v23, 1 }
  0xbb   : > { %v241_v27 = vadd.f32 %v240_v26, %v239_v23  ;;  %v243_v28 = vadd.f32 %v242_v24, %v234_v25 }
  0xbd   : > { %v244_v29 = vadd.f32 %v242_v24, %v241_v27  ;;  %v245_v30 = vmul.f32 0.5, %v243_v28 }
  0xbf   : > { %v246_v31 = vmul.f32 0.5, %v244_v29  ;;  %444 = vtanh.f32 %v245_v30 }
  0xc1   : > { %446 = vtanh.f32 %v246_v31 }
  0xcc   : > { %v445_v32 = vpop.eup %444 }
  0xcd   : > { %v249_v33 = vmul.f32 0.5, %v445_v32 }
  0xce   : > { %v447_v34 = vpop.eup %446 }
  0xcf   : > { %v250_v35 = vmul.f32 0.5, %v447_v34  ;;  %v251_v36 = vadd.f32 0.5, %v249_v33 }
  0xd1   : > { %v252_v37 = vadd.f32 0.5, %v250_v35  ;;  %v253_v38 = vadd.f32 1.0, %v251_v36 }
  0xd3   : > { %v254_v39 = vadd.f32 1.0, %v252_v37 }
  0xd5   : > { %v257_v40 = vcombine.low %v253_v38, %v254_v39 }
  0xd7   : > { %v259_v41 = vmul.f32 %v257_v40, %v210_v8 }
  0xd9   : > { %260 = vst [vmem:[%s205_s6] sm:$0xff] %v259_v41 }
  0xda   : > { %489 = shalt.err (!%p486_p3)
}
  0xdb   : > { %s490_s20 = scalar_lea.hbm %s276_s10, 128  ;;  %s494_s24 = scalar_lea.hbm %s729_s3, 256 }
  0xdc   : > { %p491_p5 = scmp.ne.s32.totalorder %s276_s10, %s490_s20  ;;  %p495_p10 = scmp.lt.s32.totalorder %s276_s10, %s729_s3 }
  0xdd   : > { %p496_p4 = scmp.lt.s32.totalorder %s494_s24, %s490_s20 }
  0xde   : > { %p492_p6 = pnand %p491_p5, %p636_p9 }
  0xdf   : > { %p497_p13 = por %p496_p4, %p495_p10 }
  0xe0   : > { %p493_p7 = pneg %p492_p6 }
  0xe2   : > { %p498_p8 = pnand %p497_p13, %p493_p7 }
  0xe4   : > { %501 = shalt.err (!%p498_p8)
}
  0xe5   : > { %381 = dma.vmem_to_hbm [thread:$0]  (%p636_p9), %s279_s7, 128, %s276_s10, %s262_s11  }
  0xe6 PF: > { %s290_s4 = sand.u32 1, %s536_s14   ;;  %p735_p11 = scmp.ne.s32.totalorder %s733_s28, 0 }
  0xe7   : > { %p736_p12 = scmp.ge.s32.totalorder %s556_s19, 2  ;;  %s291_s25 = scalar_lea.sflag [#allocation5], %s290_s4 }
  0xe9   : > { %p388_p0 = pnand %p736_p12, %p735_p11 }
  0xeb   : > { %p389_p1 = pneg %p388_p0 }
  0xed   : > { %531 = dma.done.wait (%p389_p1), %s291_s25, 128  }
  0xee   : > { %533 = vsyncadd (%p389_p1), %s291_s25, 4294967168  ;;  %s20_s19 = sadd.s32 1, %s556_s19   ;;  %s737_s14 = smov %s540_s15 }
  0xef   : > { %p17_p2 = scmp.ge.s32.totalorder %s20_s19, 4   ;;  %s738_s15 = smov %s544_s16 }
  0xf0   : > { %s739_s16 = smov %s641_s27  ;;  %s740_s17 = smov %s552_s18 }
  0xf1   : > { %s741_s18 = smov %s743_s21  ;;  %19 = sbr.rel (!%p17_p2) target bundleno = 8 (0x8), region = 77 }
  0xf6   :  { %296 = vsyncpa [#allocation4], 1 }
  0xf7   :  { %298 = vsyncpa [#allocation4 + $0x1], 1 }
  0xf8   :  { %299 = vsyncpa [#allocation5], 1 }
  0xf9   :  { %301 = vsyncpa [#allocation5 + $0x1], 1 }

</bundles_post_ra>
